<compile_context>
chip_gen: v6e
topology: v6e:2x2x1
jax: 0.10.0
libtpu: 0.0.40
codegen_flags: <defaults>
</compile_context>

<pallas_src>
import jax
import jax.numpy as jnp
from jax.experimental import pallas as pl
from jax.experimental.pallas import tpu as pltpu


def tuple_add(lhs_tuple, rhs_tuple=(4, 64)):
    """Faithful, zero-overhead equivalent of M.forward:
    operator.add(x495, (4, 64)) == tuple concatenation, done at trace time.

    This is the only path real model code should use: the result stays a
    static Python tuple, directly usable as compile-time shape metadata."""
    return tuple(lhs_tuple) + tuple(rhs_tuple)


def tuple_add_device(lhs_tuple, rhs_tuple=(4, 64)):
    """Device-array form of the result WITHOUT any kernel launch.

    The concatenation is folded at trace time; XLA embeds the int32[4]
    constant directly (zero pallas_call / custom-call dispatch cost)."""
    return jnp.asarray(tuple(lhs_tuple) + tuple(rhs_tuple), dtype=jnp.int32)


def _identity_copy_kernel(src_ref, o_ref):
    # src_ref / o_ref: (4,) int32 in SMEM.  Output HBM buffer is aliased to
    # the input, so this trivial scalar copy is all that's needed to keep
    # the (aliased) output well-defined after the kernel's SMEM writeback.
    for i in range(o_ref.shape[0]):
        o_ref[i] = src_ref[i]


def tuple_add_pallas(lhs_tuple, rhs_tuple=(4, 64)):
    """Protocol-compliance path only: a pallas_call that degenerates to pure
    metadata.  Concatenation is folded at trace time into one int32[4]
    constant; the input buffer is donated to the output via
    input_output_aliases, so no extra output allocation is made."""
    packed = jnp.asarray(tuple(lhs_tuple) + tuple(rhs_tuple), dtype=jnp.int32)
    return pl.pallas_call(
        _identity_copy_kernel,
        out_shape=jax.ShapeDtypeStruct(packed.shape, jnp.int32),
        in_specs=[pl.BlockSpec(memory_space=pltpu.MemorySpace.SMEM)],
        out_specs=pl.BlockSpec(memory_space=pltpu.MemorySpace.SMEM),
        input_output_aliases={0: 0},
    )(packed)


if __name__ == "__main__":
    # Module's forward takes a tuple of Python ints, not a tensor; PRNGKey is
    # kept only for protocol compliance (no random tensor inputs are implied).
    _ = jax.random.PRNGKey(0)

    x495 = (1, 384)
    expected = (1, 384, 4, 64)  # reference: operator.add((1, 384), (4, 64))

    # 1) Primary (recommended) path: static tuple, zero device work.
    x496 = tuple_add(x495, (4, 64))
    assert x496 == expected, f"static path: got {x496}, expected {expected}"

    # 2) Device-array path: trace-time constant, no kernel launch.
    dev = jax.block_until_ready(tuple_add_device(x495, (4, 64)))
    dev_tuple = tuple(int(v) for v in dev)
    assert dev_tuple == expected, f"constant path: got {dev_tuple}, expected {expected}"

    # 3) Pallas path (protocol compliance only), run once and verified.
    pal = jax.block_until_ready(tuple_add_pallas(x495, (4, 64)))
    pal_tuple = tuple(int(v) for v in pal)
    assert pal_tuple == expected, f"pallas path: got {pal_tuple}, expected {expected}"

    print("KERNEL_OK")
</pallas_src>

<mosaic_0001>
module attributes {stable_mosaic.version = 11 : i64} {
  func.func @_identity_copy_kernel(%arg0: memref<4xi32, #tpu.memory_space<smem>>, %arg1: memref<4xi32, #tpu.memory_space<smem>>) attributes {dimension_semantics = [], scalar_prefetch = 0 : i64, scratch_operands = 0 : i64, tpu.core_type = #tpu.core_type<tc>} {
    %c0 = arith.constant 0 : index
    %0 = memref.load %arg0[%c0] : memref<4xi32, #tpu.memory_space<smem>>
    %c0_0 = arith.constant 0 : index
    %1 = memref.load %arg1[%c0_0] : memref<4xi32, #tpu.memory_space<smem>>
    memref.store %0, %arg1[%c0_0] : memref<4xi32, #tpu.memory_space<smem>>
    %c1 = arith.constant 1 : index
    %2 = memref.load %arg0[%c1] : memref<4xi32, #tpu.memory_space<smem>>
    %c1_1 = arith.constant 1 : index
    %3 = memref.load %arg1[%c1_1] : memref<4xi32, #tpu.memory_space<smem>>
    memref.store %2, %arg1[%c1_1] : memref<4xi32, #tpu.memory_space<smem>>
    %c2 = arith.constant 2 : index
    %4 = memref.load %arg0[%c2] : memref<4xi32, #tpu.memory_space<smem>>
    %c2_2 = arith.constant 2 : index
    %5 = memref.load %arg1[%c2_2] : memref<4xi32, #tpu.memory_space<smem>>
    memref.store %4, %arg1[%c2_2] : memref<4xi32, #tpu.memory_space<smem>>
    %c3 = arith.constant 3 : index
    %6 = memref.load %arg0[%c3] : memref<4xi32, #tpu.memory_space<smem>>
    %c3_3 = arith.constant 3 : index
    %7 = memref.load %arg1[%c3_3] : memref<4xi32, #tpu.memory_space<smem>>
    memref.store %6, %arg1[%c3_3] : memref<4xi32, #tpu.memory_space<smem>>
    return
  }
}

</mosaic_0001>

<bundles_post_ra>
// kernel: tpu_custom_call.1
= control target key start
LH: loop header
LB: loop body
LE: loop exit
PB: predicated region body
PF: predicated region fallthrough
CT: control target
= control target key end

     0   :  { %6 = vsyncpa [#allocation3], 0  ;;  %s89_s0 = inlined_call_operand.hbm [shape: s32[4], index: 0, kind: input, shape index: {}, may-alias: {0,1}]   ;;  %s90_s1 = inlined_call_operand.hbm [shape: s32[4], index: 1, kind: output, shape index: {}, may-alias: {0,1}]  }
   0x1   :  { %7 = vsyncpa [#allocation4], 0  ;;  %s71_s6 = smov [#allocation2]  }
   0x2   :  { %15 = dma.hbm_to_smem %s89_s0, 16, %s71_s6, [#allocation3]  }
   0x3   :  { %67 = dma.done.wait [#allocation3], 16  }
   0x4   :  { %68 = vsyncadd [#allocation3], 4294967280 }
   0x5   :  { %19 = sfence }
   0x6   :  { %s20_s9 = sld [smem:[#allocation2]]  ;;  %s72_s13 = smov [#allocation5]  }
   0x7   :  { %s46_s10 = sld [smem:[#allocation2 + $0x1]] }
   0x8   :  { %s47_s11 = sld [smem:[#allocation2 + $0x2]] }
   0x9   :  { %s48_s12 = sld [smem:[#allocation2 + $0x3]] }
   0xc   :  { %22 = sst [smem:[#allocation5]] %s20_s9 }
   0xd   :  { %25 = sst [smem:[#allocation5 + $0x1]] %s46_s10 }
   0xe   :  { %28 = sst [smem:[#allocation5 + $0x2]] %s47_s11 }
   0xf   :  { %31 = sst [smem:[#allocation5 + $0x3]] %s48_s12 }
  0x10   :  { %39 = dma.smem_to_hbm %s72_s13, 16, %s90_s1, [#allocation4]  }
  0x11   :  { %69 = dma.done.wait [#allocation4], 16  }
  0x12   :  { %70 = vsyncadd [#allocation4], 4294967280 }
  0x13   :  { %43 = sfence }
  0x14   :  { %44 = vsyncpa [#allocation3], 1 }
  0x15   :  { %45 = vsyncpa [#allocation4], 1 }

</bundles_post_ra>
